<compile_context>
chip_gen: v7x
topology: tpu7x:2x2x1
jax: 0.10.0
libtpu: 0.0.40
codegen_flags: <defaults>
</compile_context>

<pallas_src>
import math

import jax
import jax.numpy as jnp
from jax.experimental import pallas as pl
from jax.experimental.pallas import tpu as pltpu


LANE = 128   # TPU lane width (last dim)
SUBLANE = 8  # f32 sublane width (second-to-last dim)


def _round_up(x, m):
    return (x + m - 1) // m * m


# ------------------------------- kernel --------------------------------------

def dueling_kernel(s_ref, w1_ref, b1_ref, w2_ref, b2_ref, wq_ref, bq_ref, q_ref):
    f32 = jnp.float32
    cd = w1_ref.dtype  # compute dtype for MXU operands (bf16)

    # fc1 + ReLU  (s arrives unpadded f32; cast to bf16 here, f32 accumulate)
    x = s_ref[...].astype(cd)
    h1 = jnp.dot(x, w1_ref[...], preferred_element_type=f32)
    h1 = jnp.maximum(h1 + b1_ref[...], 0.0)

    # fc2 + ReLU
    h2 = jnp.dot(h1.astype(cd), w2_ref[...], preferred_element_type=f32)
    h2 = jnp.maximum(h2 + b2_ref[...], 0.0)

    # Folded dueling head: Q = h2 @ W_q + b_q  (== V + A - mean(A) exactly)
    q = jnp.dot(h2.astype(cd), wq_ref[...], preferred_element_type=f32) + bq_ref[...]
    q_ref[...] = q.astype(q_ref.dtype)


# ------------------------- one-time parameter prep ---------------------------

def prepare_dueling_params(w1, b1, w2, b2, wv, bv, wa, ba,
                           *, compute_dtype=jnp.bfloat16):
    """Fold the dueling head, pad to lane width, cast to the MXU compute dtype.

    Call once at init / after every parameter update.  Weights are expected
    pre-transposed to (in_features, out_features); biases are 1-D.
    """
    state_dim, hidden_dim = w1.shape
    action_dim = wa.shape[1]
    h_pad = _round_up(hidden_dim, LANE)
    a_pad = _round_up(action_dim, LANE)
    f32 = jnp.float32

    # Fold V/A heads and the mean-subtraction into a single weight/bias (f32).
    wq = wv + (wa - jnp.mean(wa, axis=1, keepdims=True))        # (hidden, action_dim)
    bq = (bv + (ba - jnp.mean(ba))).reshape(1, -1)               # (1, action_dim)

    def pad2(x, rows, cols):
        return jnp.pad(x, ((0, rows - x.shape[0]), (0, cols - x.shape[1])))

    params = dict(
        # W1 keeps its real contraction dim (state_dim); only out dim is padded.
        w1=pad2(w1, state_dim, h_pad).astype(compute_dtype),
        b1=pad2(b1.reshape(1, -1), 1, h_pad).astype(f32),
        w2=pad2(w2, h_pad, h_pad).astype(compute_dtype),
        b2=pad2(b2.reshape(1, -1), 1, h_pad).astype(f32),
        wq=pad2(wq, h_pad, a_pad).astype(compute_dtype),         # padded cols = 0
        bq=pad2(bq, 1, a_pad).astype(f32),                       # padded cols = 0
        state_dim=state_dim, h_pad=h_pad, a_pad=a_pad, action_dim=action_dim,
    )
    return params


# ------------------------------- forward -------------------------------------

def dueling_net_forward(s, params, *, tile_b=512, out_dtype=jnp.bfloat16):
    """Fused Dueling_Net forward.  `params` comes from prepare_dueling_params."""
    B, state_dim = s.shape
    assert state_dim == params["state_dim"], (state_dim, params["state_dim"])
    h_pad = params["h_pad"]
    a_pad = params["a_pad"]
    action_dim = params["action_dim"]

    # Batch tiling: aim for >= 2 grid steps (feeds both v7x TensorCores) when
    # the batch allows, and size the tile to ~B/n_steps to minimize padding
    # waste in the last (masked) partial block.
    n_steps = pl.cdiv(B, tile_b)
    if B >= 2 * SUBLANE:
        n_steps = max(n_steps, 2)
    tb = _round_up(pl.cdiv(B, n_steps), SUBLANE)
    grid = (pl.cdiv(B, tb),)

    resident = lambda shape: pl.BlockSpec(shape, lambda i: (0, 0))  # stays in VMEM

    q_padded = pl.pallas_call(
        dueling_kernel,
        out_shape=jax.ShapeDtypeStruct((B, a_pad), out_dtype),
        grid_spec=pltpu.PrefetchScalarGridSpec(
            num_scalar_prefetch=0,
            grid=grid,
            in_specs=[
                pl.BlockSpec((tb, state_dim), lambda i: (i, 0)),   # s: batch-tiled, unpadded
                resident((state_dim, h_pad)),                      # W1
                resident((1, h_pad)),                              # b1
                resident((h_pad, h_pad)),                          # W2
                resident((1, h_pad)),                              # b2
                resident((h_pad, a_pad)),                          # W_q (folded head)
                resident((1, a_pad)),                              # b_q (folded head)
            ],
            out_specs=pl.BlockSpec((tb, a_pad), lambda i: (i, 0)), # lane-dense Q slab
        ),
        compiler_params=pltpu.CompilerParams(
            dimension_semantics=("parallel",),   # split batch across TCs (v7x)
        ),
    )(s, params["w1"], params["b1"], params["w2"], params["b2"],
      params["wq"], params["bq"])

    # Columns >= action_dim are exactly zero; consumers that accept the padded
    # slab can skip this slice entirely.
    return q_padded[:, :action_dim]


# ----------------------------- host-side helpers -----------------------------

def init_linear(key, fan_in, fan_out):
    """PyTorch nn.Linear default init: U(-1/sqrt(fan_in), 1/sqrt(fan_in)).
    Weight returned pre-transposed to (fan_in, fan_out)."""
    kw, kb = jax.random.split(key)
    bound = 1.0 / math.sqrt(fan_in)
    w = jax.random.uniform(kw, (fan_in, fan_out), jnp.float32, -bound, bound)
    b = jax.random.uniform(kb, (fan_out,), jnp.float32, -bound, bound)
    return w, b


def noisy_effective_params(key, w_mu, w_sigma, b_mu, b_sigma):
    """Training-mode NoisyLinear: fold factored Gaussian noise into (w, b)."""
    def scale_noise(k, n):
        x = jax.random.normal(k, (n,), jnp.float32)
        return jnp.sign(x) * jnp.sqrt(jnp.abs(x))
    ki, kj = jax.random.split(key)
    eps_i = scale_noise(ki, w_mu.shape[0])   # in_features
    eps_j = scale_noise(kj, w_mu.shape[1])   # out_features
    w = w_mu + w_sigma * jnp.outer(eps_i, eps_j)
    b = b_mu + b_sigma * eps_j
    return w, b


def reference_forward_f32(s, w1, b1, w2, b2, wv, bv, wa, ba):
    """Pure-JAX f32 reference matching the PyTorch module exactly."""
    h1 = jnp.maximum(s @ w1 + b1, 0.0)
    h2 = jnp.maximum(h1 @ w2 + b2, 0.0)
    v = h2 @ wv + bv
    a = h2 @ wa + ba
    return v + (a - jnp.mean(a, axis=-1, keepdims=True))


if __name__ == "__main__":
    # Small shapes implied by Dueling_Net.__init__ / forward (use_noisy=False).
    batch = 2
    state_dim = 16
    hidden_dim = 32
    action_dim = 6

    key = jax.random.PRNGKey(0)
    k_s, k_fc1, k_fc2, k_v, k_a = jax.random.split(key, 5)

    s = jax.random.normal(k_s, (batch, state_dim), jnp.float32)
    w1, b1 = init_linear(k_fc1, state_dim, hidden_dim)   # fc1
    w2, b2 = init_linear(k_fc2, hidden_dim, hidden_dim)  # fc2
    wv, bv = init_linear(k_v, hidden_dim, 1)             # V head
    wa, ba = init_linear(k_a, hidden_dim, action_dim)    # A head

    # One-time weight prep (hoisted out of the per-forward path).
    params = prepare_dueling_params(w1, b1, w2, b2, wv, bv, wa, ba,
                                    compute_dtype=jnp.bfloat16)
    params = jax.tree_util.tree_map(
        lambda x: jax.block_until_ready(x) if isinstance(x, jax.Array) else x,
        params)

    q = dueling_net_forward(s, params)
    q = jax.block_until_ready(q)

    ref = reference_forward_f32(s, w1, b1, w2, b2, wv, bv, wa, ba)

    assert q.shape == (batch, action_dim), q.shape
    # bf16 MXU operands + bf16 output vs an f32 reference -> loose tolerance.
    err = jnp.max(jnp.abs(q.astype(jnp.float32) - ref))
    assert jnp.allclose(q.astype(jnp.float32), ref, atol=3e-2, rtol=3e-2), (
        f"max abs err = {err}")

    print("KERNEL_OK")
</pallas_src>

<mosaic_0001>
module attributes {stable_mosaic.version = 11 : i64} {
  func.func @dueling_kernel(%arg0: i32, %arg1: memref<8x16xf32, #tpu.memory_space<vmem>>, %arg2: memref<16x128xbf16, #tpu.memory_space<vmem>>, %arg3: memref<1x128xf32, #tpu.memory_space<vmem>>, %arg4: memref<128x128xbf16, #tpu.memory_space<vmem>>, %arg5: memref<1x128xf32, #tpu.memory_space<vmem>>, %arg6: memref<128x128xbf16, #tpu.memory_space<vmem>>, %arg7: memref<1x128xf32, #tpu.memory_space<vmem>>, %arg8: memref<8x128xbf16, #tpu.memory_space<vmem>>) attributes {dimension_semantics = [#tpu.dimension_semantics<parallel>], iteration_bounds = array<i64: 1>, scalar_prefetch = 0 : i64, scratch_operands = 0 : i64, tpu.core_type = #tpu.core_type<tc>, window_params = [{transform_indices = @transform_0, window_bounds = array<i64: 8, 16>}, {pipeline_mode = #tpu.pipeline_mode<synchronous>, transform_indices = @transform_1, window_bounds = array<i64: 16, 128>}, {pipeline_mode = #tpu.pipeline_mode<synchronous>, transform_indices = @transform_2, window_bounds = array<i64: 1, 128>}, {pipeline_mode = #tpu.pipeline_mode<synchronous>, transform_indices = @transform_3, window_bounds = array<i64: 128, 128>}, {pipeline_mode = #tpu.pipeline_mode<synchronous>, transform_indices = @transform_4, window_bounds = array<i64: 1, 128>}, {pipeline_mode = #tpu.pipeline_mode<synchronous>, transform_indices = @transform_5, window_bounds = array<i64: 128, 128>}, {pipeline_mode = #tpu.pipeline_mode<synchronous>, transform_indices = @transform_6, window_bounds = array<i64: 1, 128>}, {transform_indices = @transform_7, window_bounds = array<i64: 8, 128>}]} {
    %c0 = arith.constant 0 : index
    %c0_0 = arith.constant 0 : index
    %0 = vector.load %arg1[%c0, %c0_0] : memref<8x16xf32, #tpu.memory_space<vmem>>, vector<8x16xf32>
    %1 = arith.truncf %0 : vector<8x16xf32> to vector<8x16xbf16>
    %c0_1 = arith.constant 0 : index
    %c0_2 = arith.constant 0 : index
    %2 = vector.load %arg2[%c0_1, %c0_2] : memref<16x128xbf16, #tpu.memory_space<vmem>>, vector<16x128xbf16>
    %cst = arith.constant dense<0.000000e+00> : vector<8x128xf32>
    %3 = tpu.matmul %1, %2, %cst {dimension_numbers = #tpu.dot_dimension_numbers<[1], [0], [0], [1], [0, 0, 1, 1], [], []>} : vector<8x16xbf16>, vector<16x128xbf16>, vector<8x128xf32> -> vector<8x128xf32>
    %c0_3 = arith.constant 0 : index
    %c0_4 = arith.constant 0 : index
    %4 = vector.load %arg3[%c0_3, %c0_4] : memref<1x128xf32, #tpu.memory_space<vmem>>, vector<1x128xf32>
    %5 = vector.broadcast %4 : vector<1x128xf32> to vector<8x128xf32>
    %6 = arith.addf %3, %5 : vector<8x128xf32>
    %cst_5 = arith.constant 0.000000e+00 : f32
    %7 = vector.broadcast %cst_5 : f32 to vector<8x128xf32>
    %8 = arith.maximumf %6, %7 : vector<8x128xf32>
    %9 = arith.truncf %8 : vector<8x128xf32> to vector<8x128xbf16>
    %c0_6 = arith.constant 0 : index
    %c0_7 = arith.constant 0 : index
    %10 = vector.load %arg4[%c0_6, %c0_7] : memref<128x128xbf16, #tpu.memory_space<vmem>>, vector<128x128xbf16>
    %cst_8 = arith.constant dense<0.000000e+00> : vector<8x128xf32>
    %11 = tpu.matmul %9, %10, %cst_8 {dimension_numbers = #tpu.dot_dimension_numbers<[1], [0], [0], [1], [0, 0, 1, 1], [], []>} : vector<8x128xbf16>, vector<128x128xbf16>, vector<8x128xf32> -> vector<8x128xf32>
    %c0_9 = arith.constant 0 : index
    %c0_10 = arith.constant 0 : index
    %12 = vector.load %arg5[%c0_9, %c0_10] : memref<1x128xf32, #tpu.memory_space<vmem>>, vector<1x128xf32>
    %13 = vector.broadcast %12 : vector<1x128xf32> to vector<8x128xf32>
    %14 = arith.addf %11, %13 : vector<8x128xf32>
    %cst_11 = arith.constant 0.000000e+00 : f32
    %15 = vector.broadcast %cst_11 : f32 to vector<8x128xf32>
    %16 = arith.maximumf %14, %15 : vector<8x128xf32>
    %17 = arith.truncf %16 : vector<8x128xf32> to vector<8x128xbf16>
    %c0_12 = arith.constant 0 : index
    %c0_13 = arith.constant 0 : index
    %18 = vector.load %arg6[%c0_12, %c0_13] : memref<128x128xbf16, #tpu.memory_space<vmem>>, vector<128x128xbf16>
    %cst_14 = arith.constant dense<0.000000e+00> : vector<8x128xf32>
    %19 = tpu.matmul %17, %18, %cst_14 {dimension_numbers = #tpu.dot_dimension_numbers<[1], [0], [0], [1], [0, 0, 1, 1], [], []>} : vector<8x128xbf16>, vector<128x128xbf16>, vector<8x128xf32> -> vector<8x128xf32>
    %c0_15 = arith.constant 0 : index
    %c0_16 = arith.constant 0 : index
    %20 = vector.load %arg7[%c0_15, %c0_16] : memref<1x128xf32, #tpu.memory_space<vmem>>, vector<1x128xf32>
    %21 = vector.broadcast %20 : vector<1x128xf32> to vector<8x128xf32>
    %22 = arith.addf %19, %21 : vector<8x128xf32>
    %23 = arith.truncf %22 : vector<8x128xf32> to vector<8x128xbf16>
    %c0_17 = arith.constant 0 : index
    %c0_18 = arith.constant 0 : index
    %24 = vector.load %arg8[%c0_17, %c0_18] : memref<8x128xbf16, #tpu.memory_space<vmem>>, vector<8x128xbf16>
    tpu.vector_store %arg8[%c0_17, %c0_18], %23 {strides = array<i32>} : memref<8x128xbf16, #tpu.memory_space<vmem>>, vector<8x128xbf16>,
    return
  }
  func.func @transform_0(%arg0: i32) -> (i32, i32) {
    %c0_i32 = arith.constant 0 : i32
    %c0_i32_0 = arith.constant 0 : i32
    return %arg0, %c0_i32 : i32, i32
  }
  func.func @transform_1(%arg0: i32) -> (i32, i32) {
    %c0_i32 = arith.constant 0 : i32
    %c0_i32_0 = arith.constant 0 : i32
    %c0_i32_1 = arith.constant 0 : i32
    return %c0_i32, %c0_i32_0 : i32, i32
  }
  func.func @transform_2(%arg0: i32) -> (i32, i32) {
    %c0_i32 = arith.constant 0 : i32
    %c0_i32_0 = arith.constant 0 : i32
    %c0_i32_1 = arith.constant 0 : i32
    return %c0_i32, %c0_i32_0 : i32, i32
  }
  func.func @transform_3(%arg0: i32) -> (i32, i32) {
    %c0_i32 = arith.constant 0 : i32
    %c0_i32_0 = arith.constant 0 : i32
    %c0_i32_1 = arith.constant 0 : i32
    return %c0_i32, %c0_i32_0 : i32, i32
  }
  func.func @transform_4(%arg0: i32) -> (i32, i32) {
    %c0_i32 = arith.constant 0 : i32
    %c0_i32_0 = arith.constant 0 : i32
    %c0_i32_1 = arith.constant 0 : i32
    return %c0_i32, %c0_i32_0 : i32, i32
  }
  func.func @transform_5(%arg0: i32) -> (i32, i32) {
    %c0_i32 = arith.constant 0 : i32
    %c0_i32_0 = arith.constant 0 : i32
    %c0_i32_1 = arith.constant 0 : i32
    return %c0_i32, %c0_i32_0 : i32, i32
  }
  func.func @transform_6(%arg0: i32) -> (i32, i32) {
    %c0_i32 = arith.constant 0 : i32
    %c0_i32_0 = arith.constant 0 : i32
    %c0_i32_1 = arith.constant 0 : i32
    return %c0_i32, %c0_i32_0 : i32, i32
  }
  func.func @transform_7(%arg0: i32) -> (i32, i32) {
    %c0_i32 = arith.constant 0 : i32
    %c0_i32_0 = arith.constant 0 : i32
    return %arg0, %c0_i32 : i32, i32
  }
}

</mosaic_0001>

<bundles_post_ra>
// kernel: tpu_custom_call.1
= control target key start
LH: loop header
LB: loop body
LE: loop exit
PB: predicated region body
PF: predicated region fallthrough
CT: control target
= control target key end

     0   :  { %12 = vsyncpa [#allocation3], 0  ;;  %s820_s0 = inlined_call_operand.hbm [shape: f32[2,16], index: 0, kind: input, shape index: {}]   ;;  %s821_s1 = inlined_call_operand.hbm [shape: bf16[16,128], index: 1, kind: input, shape index: {}]   ;;  %s822_s2 = inlined_call_operand.vmem [shape: f32[1,128], index: 2, kind: input, shape index: {}]   ;;  %s823_s3 = inlined_call_operand.hbm [shape: bf16[128,128], index: 3, kind: input, shape index: {}]   ;;  %s824_s4 = inlined_call_operand.vmem [shape: f32[1,128], index: 4, kind: input, shape index: {}]   ;;  %s825_s5 = inlined_call_operand.hbm [shape: bf16[128,128], index: 5, kind: input, shape index: {}]   ;;  %s826_s6 = inlined_call_operand.vmem [shape: f32[1,128], index: 6, kind: input, shape index: {}]   ;;  %s827_s7 = inlined_call_operand.hbm [shape: bf16[2,128], index: 7, kind: output, shape index: {}]  }
   0x1   :  { %13 = vsyncpa [#allocation6], 0 }
   0x2   :  { %14 = vsyncpa [#allocation9], 0 }
   0x3   :  { %15 = vsyncpa [#allocation4], 0 }
   0x4   :  { %20 = vsyncadd [#allocation3], 96  ;;  %s661_s24 = smov [#allocation5]   ;;  %s543_s28 = scalar_lea.hbm %s821_s1, 128 }
   0x5   :  { %s33_s25 = sshll.u32 %s661_s24, 4  ;;  %p544_p0 = scmp.ne.s32.totalorder %s821_s1, %s543_s28  ;;  %s34_s25 = int_to_ptr.vmem [resolvable:$true] %s33_s25 }
   0x6   :  { %p547_p1 = scmp.lt.u32.totalorder %s543_s28, %s821_s1 }
   0x8   :  { %p549_p2 = pnand %p547_p1, %p544_p0 }
   0xa   :  { %552 = shalt.err (!%p549_p2)
}
   0xb   :  { %s553_s10 = scalar_lea.vmem %s34_s25, 128  ;;  %p558_p4 = scmp.lt.s32.totalorder %s34_s25, %s34_s25 }
   0xc   :  { %p554_p3 = scmp.ne.s32.totalorder %s34_s25, %s553_s10  ;;  %p559_p5 = scmp.lt.s32.totalorder %s553_s10, %s553_s10 }
   0xe   :  { %p560_p6 = por %p559_p5, %p558_p4 }
  0x10   :  { %p561_p7 = pnand %p560_p6, %p554_p3 }
  0x12   :  { %564 = shalt.err (!%p561_p7)
}
  0x13   :  { %s662_s11 = smov 64   ;;  %s663_s12 = smov 4  }
  0x14   :  { %39 = dma.hbm_to_vmem [thread:$0]  %s821_s1, 128, %s34_s25, [#allocation6], %s662_s11, %s662_s11, %s663_s12  }
  0x15   :  { %s664_s15 = smov [#allocation2]   ;;  %s565_s19 = scalar_lea.hbm %s820_s0, 32 }
  0x16   :  { %s21_s16 = sshll.u32 %s664_s15, 4  ;;  %p566_p8 = scmp.ne.s32.totalorder %s820_s0, %s565_s19  ;;  %s22_s16 = int_to_ptr.vmem [resolvable:$true] %s21_s16 }
  0x17   :  { %p569_p9 = scmp.lt.u32.totalorder %s565_s19, %s820_s0 }
  0x19   :  { %p571_p10 = pnand %p569_p9, %p566_p8 }
  0x1b   :  { %574 = shalt.err (!%p571_p10)
}
  0x1c   :  { %s575_s24 = scalar_lea.vmem %s22_s16, 32  ;;  %s579_s1 = scalar_lea.vmem %s22_s16, 128 }
  0x1d   :  { %p576_p11 = scmp.ne.s32.totalorder %s22_s16, %s575_s24  ;;  %p580_p12 = scmp.lt.s32.totalorder %s22_s16, %s22_s16 }
  0x1e   :  { %p581_p13 = scmp.lt.s32.totalorder %s579_s1, %s575_s24 }
  0x20   :  { %p582_p0 = por %p581_p13, %p580_p12 }
  0x22   :  { %p583_p1 = pnand %p582_p0, %p576_p11 }
  0x24   :  { %586 = shalt.err (!%p583_p1)
}
  0x25   :  { %s665_s25 = smov 32   ;;  %s666_s26 = smov 2  }
  0x26   :  { %27 = dma.hbm_to_vmem [thread:$0]  %s820_s0, 32, %s22_s16, [#allocation3], %s665_s25, %s665_s25, %s666_s26  }
  0x27   :  { %s667_s29 = smov [#allocation7]   ;;  %s668_s8 = smov [#allocation8]  }
  0x28   :  { %s47_s30 = sshll.u32 %s667_s29, 4  ;;  %s61_s9 = sshll.u32 %s668_s8, 4  ;;  %s48_s30 = int_to_ptr.vmem [resolvable:$true] %s47_s30  ;;  %s742_s9 = int_to_ptr.vmem [resolvable:$true] %s61_s9 }
  0x29   :  { %s587_s14 = scalar_lea.hbm %s823_s3, 1024 }
  0x2a   :  { %p588_p2 = scmp.ne.s32.totalorder %s823_s3, %s587_s14  ;;  %p591_p3 = scmp.lt.u32.totalorder %s587_s14, %s823_s3 }
  0x2c   :  { %p593_p4 = pnand %p591_p3, %p588_p2 }
  0x2e   :  { %596 = shalt.err (!%p593_p4)
}
  0x2f   :  { %s597_s0 = scalar_lea.vmem %s48_s30, 1024  ;;  %p602_p6 = scmp.lt.s32.totalorder %s48_s30, %s48_s30 }
  0x30   :  { %p598_p5 = scmp.ne.s32.totalorder %s48_s30, %s597_s0  ;;  %p603_p7 = scmp.lt.s32.totalorder %s597_s0, %s597_s0 }
  0x32   :  { %p604_p8 = por %p603_p7, %p602_p6 }
  0x34   :  { %p605_p9 = pnand %p604_p8, %p598_p5 }
  0x36   :  { %608 = shalt.err (!%p605_p9)
}
  0x37   :  { %53 = dma.hbm_to_vmem [thread:$0]  %s823_s3, 1024, %s48_s30, [#allocation6], %s662_s11, %s662_s11, %s663_s12  }
  0x38   :  { %s609_s23 = scalar_lea.hbm %s825_s5, 1024 }
  0x39   :  { %p610_p10 = scmp.ne.s32.totalorder %s825_s5, %s609_s23  ;;  %p613_p11 = scmp.lt.u32.totalorder %s609_s23, %s825_s5 }
  0x3b   :  { %p615_p12 = pnand %p613_p11, %p610_p10 }
  0x3d   :  { %618 = shalt.err (!%p615_p12)
}
  0x3e   :  { %s619_s27 = scalar_lea.vmem %s742_s9, 1024  ;;  %p624_p0 = scmp.lt.s32.totalorder %s742_s9, %s742_s9 }
  0x3f   :  { %p620_p13 = scmp.ne.s32.totalorder %s742_s9, %s619_s27  ;;  %p625_p1 = scmp.lt.s32.totalorder %s619_s27, %s619_s27 }
  0x41   :  { %p626_p2 = por %p625_p1, %p624_p0 }
  0x43   :  { %p627_p3 = pnand %p626_p2, %p620_p13 }
  0x45   :  { %630 = shalt.err (!%p627_p3)
}
  0x46   :  { %67 = dma.hbm_to_vmem [thread:$0]  %s825_s5, 1024, %s742_s9, [#allocation9], %s662_s11, %s662_s11, %s663_s12  }
  0x47   :  { %653 = dma.done.wait [#allocation3], 128  }
  0x48   :  { %654 = vsyncadd [#allocation3], 4294967168 }
  0x49   :  { %655 = dma.done.wait [#allocation6], 1152  }
  0x4a   :  { %656 = vsyncadd [#allocation6], 4294966144 }
  0x4b   :  { %657 = dma.done.wait [#allocation9], 1024  }
  0x4c   :  { %658 = vsyncadd [#allocation9], 4294966272  ;;  %v669_v0 = vmov 0.0   ;;  %vm670_vm0 = vmmov 0   ;;  %v526_v1 = vld [vmem:[#allocation5] sm:$0xff]   ;;  %v83_v2 = vld [vmem:[#allocation2] sm:$0xff]  ;;  %v375_v38 = vlaneseq }
  0x4d   :  { %466 = vmatprep.subr.bf16.mxu0 %v669_v0  ;;  %468 = vmatprep.mubr.msk.bf16.mxu0 %vm670_vm0, %v669_v0  ;;  %v84_v3 = vpack.c.bf16 %v83_v2, %v83_v2  ;;  %vm100_vm1 = vcmask 130048   ;;  %v527_v4 = vld [vmem:[#allocation7] sm:$0xff]   ;;  %v528_v5 = vld [vmem:[#allocation7 + $0x8] sm:$0xff]   ;;  %v529_v6 = vld [vmem:[#allocation7 + $0x10] sm:$0xff]   ;;  %v671_v36 = vmov 1966171168  }
  0x4e   :  { %472 = vmatprep.subr.bf16.mxu1 %v669_v0  ;;  %488 = vmatprep.mubr.msk.bf16.mxu1 %vm670_vm0, %v669_v0  ;;  %v530_v7 = vld [vmem:[#allocation7 + $0x18] sm:$0xff]   ;;  %v531_v8 = vld [vmem:[#allocation7 + $0x20] sm:$0xff]   ;;  %v532_v9 = vld [vmem:[#allocation7 + $0x28] sm:$0xff]   ;;  %v373_v37 = vunpack.c.l.s4 %v671_v36  ;;  %v376_v40 = vshrl.u32 %v375_v38, 7 }
  0x4f   :  { %467 = vmatpush3.bf16.msra.mxu0 %v526_v1  ;;  %473 = vmatpush3.bf16.msra.mxu1 %v527_v4  ;;  %v533_v10 = vld [vmem:[#allocation7 + $0x30] sm:$0xff]   ;;  %v534_v11 = vld [vmem:[#allocation7 + $0x38] sm:$0xff]   ;;  %v535_v12 = vld [vmem:[#allocation8] sm:$0xff]  }
  0x50   :  { %492 = vmatprep.subr.bf16.mxu0 %v669_v0  ;;  %474 = vmatprep.subr.bf16.mxu1 %v669_v0  ;;  %v536_v13 = vld [vmem:[#allocation8 + $0x8] sm:$0xff]   ;;  %v537_v14 = vld [vmem:[#allocation8 + $0x10] sm:$0xff]   ;;  %v538_v15 = vld [vmem:[#allocation8 + $0x18] sm:$0xff]   ;;  %v374_v39 = vunpack.c.0.s8 %v373_v37 }
  0x51   :  { %v539_v16 = vld [vmem:[#allocation8 + $0x20] sm:$0xff]   ;;  %v540_v17 = vld [vmem:[#allocation8 + $0x28] sm:$0xff]   ;;  %v423_v18 = vld [vmem:[%s822_s2] ss:$0 sm:$0xff] }
  0x52   :  { %469 = vmatmul.mubr.msk.bf16.vlgmr.msra.gmra.mrb[0].mxu0 %vm100_vm1, %v84_v3  ;;  %v541_v26 = vld [vmem:[#allocation8 + $0x30] sm:$0xff]   ;;  %v542_v27 = vld [vmem:[#allocation8 + $0x38] sm:$0xff]   ;;  %v377_v44 = vsub.s32 %v374_v39, %v376_v40 }
  0x53   :  { %508 = vmatprep.mubr.msk.bf16.mxu0 %vm670_vm0, %v669_v0  ;;  %475 = vmatpush3.bf16.msra.mxu1 %v528_v5  ;;  %v426_v28 = vld [vmem:[%s824_s4] ss:$0 sm:$0xff] }
  0x54   :  { %476 = vmatprep.subr.bf16.mxu1 %v669_v0  ;;  %493 = vmatpush3.bf16.msra.mxu0 %v535_v12  ;;  %v435_v41 = vld [vmem:[%s826_s6] ss:$0 sm:$0xff] }
  0x55   :  { %494 = vmatprep.subr.bf16.mxu0 %v669_v0 }
  0x57   :  { %477 = vmatpush3.bf16.msra.mxu1 %v529_v6 }
  0x58   :  { %478 = vmatprep.subr.bf16.mxu1 %v669_v0  ;;  %495 = vmatpush3.bf16.msra.mxu0 %v536_v13 }
  0x59   :  { %496 = vmatprep.subr.bf16.mxu0 %v669_v0 }
  0x5b   :  { %479 = vmatpush3.bf16.msra.mxu1 %v530_v7 }
  0x5c   :  { %480 = vmatprep.subr.bf16.mxu1 %v669_v0  ;;  %497 = vmatpush3.bf16.msra.mxu0 %v537_v14 }
  0x5d   :  { %498 = vmatprep.subr.bf16.mxu0 %v669_v0 }
  0x5f   :  { %481 = vmatpush3.bf16.msra.mxu1 %v531_v8 }
  0x60   :  { %482 = vmatprep.subr.bf16.mxu1 %v669_v0  ;;  %499 = vmatpush3.bf16.msra.mxu0 %v538_v15 }
  0x61   :  { %500 = vmatprep.subr.bf16.mxu0 %v669_v0 }
  0x63   :  { %483 = vmatpush3.bf16.msra.mxu1 %v532_v9 }
  0x64   :  { %484 = vmatprep.subr.bf16.mxu1 %v669_v0  ;;  %501 = vmatpush3.bf16.msra.mxu0 %v539_v16 }
  0x65   :  { %502 = vmatprep.subr.bf16.mxu0 %v669_v0 }
  0x67   :  { %485 = vmatpush3.bf16.msra.mxu1 %v533_v10 }
  0x68   :  { %486 = vmatprep.subr.bf16.mxu1 %v669_v0  ;;  %503 = vmatpush3.bf16.msra.mxu0 %v540_v17 }
  0x69   :  { %504 = vmatprep.subr.bf16.mxu0 %v669_v0 }
  0x6b   :  { %487 = vmatpush3.bf16.msra.mxu1 %v534_v11 }
  0x6c   :  { %505 = vmatpush3.bf16.msra.mxu0 %v541_v26 }
  0x6d   :  { %506 = vmatprep.subr.bf16.mxu0 %v669_v0 }
  0x70   :  { %507 = vmatpush3.bf16.msra.mxu0 %v542_v27 }
 0x125   :  { %v138_v19 = vpop.f32.mrb[0].mxu0 }
 0x126   :  { %v139_v20 = vadd.f32 %v423_v18, %v138_v19  ;;  %v470_v21 = vpop.f32.mrb[1].mxu0 }
 0x127   :  { %v141_v22 = vpop.f32.mrb[2].mxu0 }
 0x128   :  { %v144_v23 = vmax.f32 %v139_v20, 0.0  ;;  %v471_v24 = vpop.f32.mrb[3].mxu0 }
 0x12a   :  { %v145_v25 = vpack.c.bf16 %v144_v23, %v144_v23 }
 0x12c   :  { %489 = vmatmul.mubr.bf16.vlgmr.msra.gmra.mrb[0].mxu1 %v145_v25 }
 0x1ff   :  { %v251_v29 = vpop.f32.mrb[0].mxu1 }
 0x200   :  { %v252_v30 = vadd.f32 %v426_v28, %v251_v29  ;;  %v490_v31 = vpop.f32.mrb[1].mxu1 }
 0x201   :  { %v254_v32 = vpop.f32.mrb[2].mxu1 }
 0x202   :  { %v257_v33 = vmax.f32 %v252_v30, 0.0  ;;  %v491_v34 = vpop.f32.mrb[3].mxu1 }
 0x204   :  { %v258_v35 = vpack.c.bf16 %v257_v33, %v257_v33 }
 0x206   :  { %509 = vmatmul.mubr.bf16.vlgmr.msra.gmra.mrb[4].mxu0 %v258_v35 }
 0x2d9   :  { %v364_v42 = vpop.f32.mrb[4].mxu0 }
 0x2da   :  { %v365_v43 = vadd.f32 %v435_v41, %v364_v42  ;;  %v510_v45 = vpop.f32.mrb[5].mxu0 }
 0x2db   :  { %v367_v46 = vpop.f32.mrb[6].mxu0 }
 0x2dc   :  { %v370_v47 = vpack.c.bf16 %v365_v43, %v365_v43  ;;  %v511_v48 = vpop.f32.mrb[7].mxu0 }
 0x2de   :  { %v378_v49 = vrot.slane %v370_v47, %v377_v44 }
 0x2e0   :  { %v379_v50 = vcombine.high %v378_v49, %v378_v49  ;;  %v386_v51 = vrot.slane %v378_v49, %v377_v44  ;;  %444 = vst.sshfl [vmem:[#allocation10] sm:$0x1 pattern:$0x73625140] %v378_v49 }
 0x2e2   :  { %v393_v52 = vrot.slane %v379_v50, %v377_v44  ;;  %v394_v53 = vcombine.high %v386_v51, %v386_v51  ;;  %445 = vst.sshfl [vmem:[#allocation10 + $0x1] sm:$0x1 pattern:$0x73625140] %v379_v50 }
 0x2e4   :  { %v395_v54 = vcombine.high %v393_v52, %v393_v52  ;;  %402 = vst [vmem:[#allocation10 + $0x2] sm:$0x1] %v394_v53 }
 0x2e6   :  { %403 = vst [vmem:[#allocation10 + $0x3] sm:$0x1] %v395_v54 }
 0x2e7   :  { %408 = vsyncadd [#allocation4], 48  ;;  %s672_s4 = smov [#allocation10]  }
 0x2e8   :  { %s409_s6 = sshll.u32 %s672_s4, 4  ;;  %s410_s6 = int_to_ptr.vmem [resolvable:$true] %s409_s6 }
 0x2e9   :  { %s631_s8 = scalar_lea.vmem %s410_s6, 16  ;;  %s635_s9 = scalar_lea.vmem %s410_s6, 64 }
 0x2ea   :  { %p632_p4 = scmp.ne.s32.totalorder %s410_s6, %s631_s8  ;;  %p636_p5 = scmp.lt.s32.totalorder %s410_s6, %s410_s6 }
 0x2eb   :  { %p637_p6 = scmp.lt.s32.totalorder %s635_s9, %s631_s8 }
 0x2ed   :  { %p638_p7 = por %p637_p6, %p636_p5 }
 0x2ef   :  { %p639_p8 = pnand %p638_p7, %p632_p4 }
 0x2f1   :  { %642 = shalt.err (!%p639_p8)
}
 0x2f2   :  { %s643_s14 = scalar_lea.hbm %s827_s7, 16 }
 0x2f3   :  { %p644_p9 = scmp.ne.s32.totalorder %s827_s7, %s643_s14  ;;  %p647_p10 = scmp.lt.u32.totalorder %s643_s14, %s827_s7 }
 0x2f5   :  { %p649_p11 = pnand %p647_p10, %p644_p9 }
 0x2f7   :  { %652 = shalt.err (!%p649_p11)
}
 0x2f8   :  { %s673_s0 = smov 16   ;;  %s674_s16 = smov 1  }
 0x2f9   :  { %415 = dma.vmem_to_hbm [thread:$0]  %s410_s6, 16, %s827_s7, [#allocation4], %s673_s0, %s673_s0, %s674_s16  }
 0x2fa   :  { %659 = dma.done.wait [#allocation4], 64  }
 0x2fb   :  { %660 = vsyncadd [#allocation4], 4294967232 }
 0x2fc   :  { %419 = vsyncpa [#allocation3], 1 }
 0x2fd   :  { %420 = vsyncpa [#allocation6], 1 }
 0x2fe   :  { %421 = vsyncpa [#allocation9], 1 }
 0x2ff   :  { %422 = vsyncpa [#allocation4], 1 }

</bundles_post_ra>
